<compile_context>
chip_gen: v6e
topology: v6e:2x2x1
jax: 0.10.0
libtpu: 0.0.40
codegen_flags: <defaults>
</compile_context>

<pallas_src>
import functools

import numpy as np

import jax
import jax.numpy as jnp
from jax import lax
from jax.experimental import pallas as pl
from jax.experimental.pallas import tpu as pltpu


# ----------------------------------------------------------------------------
# Host-side helpers
# ----------------------------------------------------------------------------
def _window_matrix(l_in, l_out, kernel_size, stride, pad):
    """Constant (l_out, l_in) f32 matrix with out[t] = sum_l W[t, l] * x[l].

    Replicate padding is folded into the first / last columns.
    """
    w = np.zeros((l_out, l_in), np.float32)
    rows = np.arange(l_out)
    inv_k = 1.0 / float(kernel_size)
    for k in range(kernel_size):
        src = np.clip(rows * stride + k - pad, 0, l_in - 1)
        w[rows, src] += inv_k
    return jnp.asarray(w)


def _vmem_budget():
    """Generation-aware VMEM sizing (v5e/v6e: 128 MiB, v7x: 64 MiB physical)."""
    try:
        info = pltpu.get_tpu_info()
        cap = int(getattr(info, "vmem_capacity_bytes", 0) or 0) or (64 << 20)
    except Exception:
        cap = 64 << 20  # conservative (v7x-sized) default
    budget = cap // 2                                   # per-step working set
    limit = min(int(cap * 0.85), 100 * 1024 * 1024)     # scoped-VMEM limit
    return budget, limit


def _pick_lane_tile(n_lanes, bytes_per_lane, resident_bytes, budget,
                    n_other_steps):
    """Largest lane tile (multiple of 128 when possible) under the VMEM budget,
    split further so the grid has >= 2 steps (v7x megacore)."""
    if n_lanes % 128 == 0:
        cands = ([c for c in (4096, 2048, 1024, 512, 256, 128)
                  if n_lanes % c == 0] or [n_lanes])
    else:
        cands = [n_lanes]
    c_tile = cands[-1]
    for c in cands:
        if c * bytes_per_lane + resident_bytes <= budget:
            c_tile = c
            break
    # TODO(synk): if even the smallest lane tile exceeds the budget (extremely
    # long L), tile the time axis with a 2*pad halo instead of taking full L.
    while n_other_steps * (n_lanes // c_tile) < 2 and c_tile % 256 == 0:
        c_tile //= 2
    return c_tile


# ----------------------------------------------------------------------------
# Kernels
# ----------------------------------------------------------------------------
def _matmul_kernel(w_ref, x_ref, o_ref):
    # w_ref: (l_out, L) f32 banded window matrix (resident across grid steps)
    # x_ref: (L, c_tile) input slab, o_ref: (l_out, c_tile) output slab
    o_ref[...] = jnp.dot(
        w_ref[...],
        x_ref[...].astype(jnp.float32),
        preferred_element_type=jnp.float32,
        precision=lax.Precision.HIGHEST,
    ).astype(o_ref.dtype)


def _make_tap_kernel(kernel_size, stride, pad, l_in, l_out):
    """Fallback: O(K) tap loop reading straight from x_ref (no padded scratch).

    Replicate padding is handled analytically: per output row, the number of
    window taps clamping to the first / last input row is computed from an iota
    and added as fcnt*x[0] + bcnt*x[L-1]; interior taps are static-offset reads.
    """
    inv_k = 1.0 / float(kernel_size)

    def kernel(x_ref, o_ref, acc_ref):
        ct = x_ref.shape[-1]
        t_idx = lax.broadcasted_iota(jnp.int32, (l_out, ct), 0)
        fcnt = jnp.clip(pad - t_idx * stride, 0, kernel_size).astype(jnp.float32)
        bcnt = jnp.clip(t_idx * stride + kernel_size - (pad + l_in),
                        0, kernel_size).astype(jnp.float32)
        row0 = x_ref[0:1, :].astype(jnp.float32)
        rowl = x_ref[l_in - 1:l_in, :].astype(jnp.float32)
        acc_ref[...] = fcnt * row0 + bcnt * rowl

        reg = jnp.zeros((l_out, ct), jnp.float32)
        for k in range(kernel_size):
            off = k - pad
            t_lo = 0 if off >= 0 else (-off + stride - 1) // stride
            hi = l_in - 1 - off
            t_hi = min(l_out, hi // stride + 1) if hi >= 0 else 0
            if t_hi <= t_lo:
                continue
            n = t_hi - t_lo
            start = t_lo * stride + off
            if stride == 1:
                mid = x_ref[start:start + n, :].astype(jnp.float32)
            else:
                # TODO(synk): verify Mosaic lowers the sublane-strided read
                # without a relayout copy; correct either way.
                mid = x_ref[pl.ds(start, n, stride), :].astype(jnp.float32)
            if n == l_out:
                reg = reg + mid
            else:
                acc_ref[t_lo:t_hi, :] = acc_ref[t_lo:t_hi, :] + mid
        o_ref[...] = ((acc_ref[...] + reg) * inv_k).astype(o_ref.dtype)

    return kernel


# ----------------------------------------------------------------------------
# Wrapper
# ----------------------------------------------------------------------------
@functools.partial(jax.jit, static_argnames=("kernel_size", "stride", "force_path"))
def moving_avg(x, *, kernel_size: int, stride: int, force_path=None):
    """x: (B, L, C) -> (B, L_out, C), matching the PyTorch moving_avg module.

    force_path: None (auto), "matmul", or "taps".
    """
    B, L, C = x.shape
    pad = (kernel_size - 1) // 2
    l_out = (L + 2 * pad - kernel_size) // stride + 1

    budget, vmem_limit = _vmem_budget()
    itemsize = x.dtype.itemsize
    w_bytes = l_out * L * 4

    if force_path is None:
        use_matmul = 2 * w_bytes <= budget // 2
    else:
        use_matmul = (force_path == "matmul")

    # Per-lane footprint: double-buffered input & output columns + f32 temps.
    bytes_per_lane = 2 * (L + l_out) * itemsize + 4 * (L + 2 * l_out)
    resident = 2 * w_bytes if use_matmul else 0

    folded = (C % 128) != 0  # small / ragged C: fold (B, C) into the lane axis
    if folded:
        n_lanes = B * C
        x_arg = jnp.transpose(x, (1, 0, 2)).reshape(L, n_lanes)
        c_tile = _pick_lane_tile(n_lanes, bytes_per_lane, resident, budget, 1)
        grid = (n_lanes // c_tile,)
        x_spec = pl.BlockSpec((L, c_tile), lambda c: (0, c))
        o_spec = pl.BlockSpec((l_out, c_tile), lambda c: (0, c))
        w_spec = pl.BlockSpec((l_out, L), lambda c: (0, 0))
        out_shape = jax.ShapeDtypeStruct((l_out, n_lanes), x.dtype)
        dim_sem = ("parallel",)
        post = lambda o: jnp.transpose(o.reshape(l_out, B, C), (1, 0, 2))
    else:
        n_lanes = C
        x_arg = x
        c_tile = _pick_lane_tile(n_lanes, bytes_per_lane, resident, budget, B)
        grid = (B, n_lanes // c_tile)
        x_spec = pl.BlockSpec((None, L, c_tile), lambda b, c: (b, 0, c))
        o_spec = pl.BlockSpec((None, l_out, c_tile), lambda b, c: (b, 0, c))
        w_spec = pl.BlockSpec((l_out, L), lambda b, c: (0, 0))
        out_shape = jax.ShapeDtypeStruct((B, l_out, C), x.dtype)
        dim_sem = ("parallel", "parallel")
        post = lambda o: o

    if use_matmul:
        w = _window_matrix(L, l_out, kernel_size, stride, pad)
        kernel = _matmul_kernel
        in_specs = [w_spec, x_spec]
        operands = (w, x_arg)
        scratch = []
    else:
        # TODO(synk): for extremely long L a cumsum-difference / halo-tiled
        # formulation would cut the O(K) tap reads further.
        kernel = _make_tap_kernel(kernel_size, stride, pad, L, l_out)
        in_specs = [x_spec]
        operands = (x_arg,)
        scratch = [pltpu.VMEM((l_out, c_tile), jnp.float32)]

    out = pl.pallas_call(
        kernel,
        out_shape=out_shape,
        grid_spec=pltpu.PrefetchScalarGridSpec(
            num_scalar_prefetch=0,
            grid=grid,
            in_specs=in_specs,
            out_specs=o_spec,
            scratch_shapes=scratch),
        compiler_params=pltpu.CompilerParams(
            dimension_semantics=dim_sem,
            vmem_limit_bytes=vmem_limit),
    )(*operands)
    return post(out)


# ----------------------------------------------------------------------------
# Pure-JAX reference (mirrors the PyTorch module)
# ----------------------------------------------------------------------------
def _reference_moving_avg(x, kernel_size, stride):
    pad = (kernel_size - 1) // 2
    front = jnp.repeat(x[:, :1, :], pad, axis=1)
    end = jnp.repeat(x[:, -1:, :], pad, axis=1)
    xp = jnp.concatenate([front, x, end], axis=1)
    l_pad = xp.shape[1]
    l_out = (l_pad - kernel_size) // stride + 1
    outs = [jnp.mean(xp[:, t * stride:t * stride + kernel_size, :], axis=1)
            for t in range(l_out)]
    return jnp.stack(outs, axis=1)


if __name__ == "__main__":
    def _check(out, ref, name):
        assert out.shape == ref.shape, (name, out.shape, ref.shape)
        assert jnp.allclose(out, ref, atol=1e-4, rtol=1e-4), f"mismatch: {name}"

    key = jax.random.PRNGKey(0)

    # Case 1: lane-dense channels -> direct layout, MXU window-matrix path.
    B, L, C = 2, 16, 128
    x = jax.random.normal(key, (B, L, C), dtype=jnp.float32)
    out = jax.block_until_ready(moving_avg(x, kernel_size=5, stride=1))
    _check(out, _reference_moving_avg(x, 5, 1), "matmul/direct")

    # Case 2: tap-loop fallback path (kept tested).
    out = jax.block_until_ready(
        moving_avg(x, kernel_size=5, stride=1, force_path="taps"))
    _check(out, _reference_moving_avg(x, 5, 1), "taps/direct")

    # Case 3: small channel count (SimMTM-style C=7) -> folded lane-dense layout.
    x_small = jax.random.normal(jax.random.PRNGKey(0), (2, 16, 7),
                                dtype=jnp.float32)
    out = jax.block_until_ready(moving_avg(x_small, kernel_size=5, stride=1))
    _check(out, _reference_moving_avg(x_small, 5, 1), "matmul/folded")

    # Case 4: stride > 1 and even kernel size.
    out = jax.block_until_ready(moving_avg(x, kernel_size=4, stride=2))
    _check(out, _reference_moving_avg(x, 4, 2), "matmul/stride2")

    print("KERNEL_OK")
</pallas_src>

<mosaic_0001>
module attributes {stable_mosaic.version = 11 : i64} {
  func.func @_matmul_kernel(%arg0: i32, %arg1: i32, %arg2: memref<16x16xf32, #tpu.memory_space<vmem>>, %arg3: memref<1x16x128xf32, #tpu.memory_space<vmem>>, %arg4: memref<1x16x128xf32, #tpu.memory_space<vmem>>) attributes {dimension_semantics = [#tpu.dimension_semantics<parallel>, #tpu.dimension_semantics<parallel>], iteration_bounds = array<i64: 2, 1>, scalar_prefetch = 0 : i64, scratch_operands = 0 : i64, tpu.core_type = #tpu.core_type<tc>, window_params = [{pipeline_mode = #tpu.pipeline_mode<synchronous>, transform_indices = @transform_0, window_bounds = array<i64: 16, 16>}, {transform_indices = @transform_1, window_bounds = array<i64: 1, 16, 128>}, {transform_indices = @transform_2, window_bounds = array<i64: 1, 16, 128>}]} {
    %c0 = arith.constant 0 : index
    %c0_0 = arith.constant 0 : index
    %0 = vector.load %arg2[%c0, %c0_0] : memref<16x16xf32, #tpu.memory_space<vmem>>, vector<16x16xf32>
    %c0_1 = arith.constant 0 : index
    %c0_2 = arith.constant 0 : index
    %c0_3 = arith.constant 0 : index
    %1 = vector.load %arg3[%c0_1, %c0_2, %c0_3] : memref<1x16x128xf32, #tpu.memory_space<vmem>>, vector<1x16x128xf32>
    %2 = vector.shape_cast %1 : vector<1x16x128xf32> to vector<16x128xf32>
    %cst = arith.constant dense<0.000000e+00> : vector<16x128xf32>
    %3 = tpu.matmul %0, %2, %cst {dimension_numbers = #tpu.dot_dimension_numbers<[1], [0], [0], [1], [0, 0, 1, 1], [], []>, precision = #tpu.contract_precision<fp32>} : vector<16x16xf32>, vector<16x128xf32>, vector<16x128xf32> -> vector<16x128xf32>
    %c0_4 = arith.constant 0 : index
    %c0_5 = arith.constant 0 : index
    %c0_6 = arith.constant 0 : index
    %4 = vector.load %arg4[%c0_4, %c0_5, %c0_6] : memref<1x16x128xf32, #tpu.memory_space<vmem>>, vector<1x16x128xf32>
    %5 = vector.shape_cast %4 : vector<1x16x128xf32> to vector<16x128xf32>
    %6 = vector.shape_cast %3 : vector<16x128xf32> to vector<1x16x128xf32>
    tpu.vector_store %arg4[%c0_4, %c0_5, %c0_6], %6 {strides = array<i32>} : memref<1x16x128xf32, #tpu.memory_space<vmem>>, vector<1x16x128xf32>,
    return
  }
  func.func @transform_0(%arg0: i32, %arg1: i32) -> (i32, i32) {
    %c0_i32 = arith.constant 0 : i32
    %c0_i32_0 = arith.constant 0 : i32
    %c0_i32_1 = arith.constant 0 : i32
    return %c0_i32, %c0_i32_0 : i32, i32
  }
  func.func @transform_1(%arg0: i32, %arg1: i32) -> (i32, i32, i32) {
    %c0_i32 = arith.constant 0 : i32
    %c0_i32_0 = arith.constant 0 : i32
    return %arg0, %c0_i32, %arg1 : i32, i32, i32
  }
  func.func @transform_2(%arg0: i32, %arg1: i32) -> (i32, i32, i32) {
    %c0_i32 = arith.constant 0 : i32
    %c0_i32_0 = arith.constant 0 : i32
    return %arg0, %c0_i32, %arg1 : i32, i32, i32
  }
}

</mosaic_0001>

<bundles_post_ra>
// kernel: moving_avg.1
= control target key start
LH: loop header
LB: loop body
LE: loop exit
PB: predicated region body
PF: predicated region fallthrough
CT: control target
= control target key end

     0   :  { %7 = vsyncpa [#allocation3], 0  ;;  %s1336_s0 = inlined_call_operand.hbm [shape: f32[16,16], index: 0, kind: input, shape index: {}]   ;;  %s1337_s1 = inlined_call_operand.hbm [shape: f32[2,16,128], index: 1, kind: input, shape index: {}]   ;;  %s1338_s2 = inlined_call_operand.hbm [shape: f32[2,16,128], index: 2, kind: output, shape index: {}]  }
   0x1   :  { %8 = vsyncpa [#allocation6], 0 }
   0x2   :  { %10 = vsyncpa [#allocation6 + $0x1], 0 }
   0x3   :  { %11 = vsyncpa [#allocation4], 0 }
   0x4   :  { %13 = vsyncpa [#allocation4 + $0x1], 0  ;;  %s1145_s9 = smov 0   ;;  %s1147_s10 = smov 0  }
   0x5   :  { %s1149_s11 = smov 0   ;;  %s1151_s12 = smov 0  }
   0x6   :  { %s1153_s13 = smov 0   ;;  %s1155_s14 = smov 0  }
   0x7 LB: > { %s821_s15 = sadd.s32 4294967295, %s1121_s14   ;;  %s822_s16 = sadd.s32 4294967294, %s1121_s14   ;;  %s1121_s14 = sphi %s1155_s14, %s19_s14   ;;  %s1117_s13 = sphi %s1153_s13, %s1358_s13   ;;  %s1113_s12 = sphi %s1151_s12, %s1357_s12   ;;  %s1109_s11 = sphi %s1149_s11, %s1356_s11   ;;  %s1105_s10 = sphi %s1147_s10, %s1355_s10   ;;  %s1101_s9 = sphi %s1145_s9, %s1354_s9  }
   0x8   : > { %p74_p0 = scmp.ne.s32.totalorder %s1105_s10, %s1101_s9  ;;  %p1179_p1 = scmp.eq.s32.totalorder %s821_s15, 0 }
   0x9   : > { %p1183_p2 = scmp.eq.s32.totalorder %s821_s15, 1  ;;  %p106_p3 = scmp.eq.s32.totalorder %s822_s16, 1 }
   0xa   : > { %p1189_p4 = por %p1179_p1, %p74_p0  ;;  %p823_p5 = scmp.ge.s32.totalorder %s1121_s14, 1 }
   0xb   : > { %p1194_p6 = por %p106_p3, %p74_p0  ;;  %p113_p7 = scmp.lt.s32.totalorder %s1121_s14, 3 }
   0xc   : > { %s1343_s19 = scalar_select %p1189_p4, 1, 0 }
   0xd   : > { %s1344_s20 = scalar_select %p1194_p6, 1, 0 }
   0xe   : > { %p1199_p8 = pnand %p823_p5, %p113_p7  ;;  %s1123_s22 = smov [#allocation2]  }
   0xf   : > { %s125_s23 = sshll.u32 %s1123_s22, 4  ;;  %s31_s25 = sadd.s32 1, %s1117_s13  ;;  %s126_s23 = int_to_ptr.vmem [resolvable:$true] %s125_s23 }
  0x10   : > { %p914_p9 = pneg %p1199_p8  ;;  %s994_s26 = scalar_lea.vmem %s126_s23, 256 }
  0x11   : > { %p995_p13 = scmp.ne.s32.totalorder %s126_s23, %s994_s26  ;;  %p1002_p5 = scmp.lt.s32.totalorder %s126_s23, %s126_s23 }
  0x12   : > { %p1208_p11 = pnand %p914_p9, %p1179_p1  ;;  %p1003_p7 = scmp.lt.s32.totalorder %s994_s26, %s994_s26 }
  0x14   : > { %p985_p12 = pneg %p1208_p11  ;;  %p1004_p6 = por %p1003_p7, %p1002_p5 }
  0x16   : > { %p997_p0 = pnand %p995_p13, %p985_p12 }
  0x18   : > { %p998_p3 = pneg %p997_p0 }
  0x1a   : > { %p1005_p4 = pnand %p1004_p6, %p998_p3 }
  0x1c   : > { %1008 = shalt.err (!%p1005_p4)
}
  0x1d   : > { %s1340_s27 = smov 128   ;;  %s1125_s28 = smov 8  }
  0x1e   : > { %917 = dma.hbm_to_vmem [thread:$0]  (!%p1208_p11), %s1336_s0, 256, %s126_s23, [#allocation3], %s1340_s27, %s1340_s27, %s1125_s28  }
  0x1f   : > { %p33_p4 = scmp.ge.s32.totalorder %s31_s25, 2  ;;  %s61_s3 = sadd.s32 1, %s1109_s11 }
  0x20   : > { %p68_p6 = scmp.ne.s32.totalorder %s1109_s11, %s1105_s10  ;;  %p69_p9 = scmp.eq.s32.totalorder %s1121_s14, 0 }
  0x21   : > { %s1360_s25 = smov (%p33_p4, %s31_s25), 0  ;;  %p927_p0 = scmp.lt.s32.totalorder %s1121_s14, 2 }
  0x22   : > { %p1229_p12 = por %p69_p9, %p68_p6  ;;  %p1235_p13 = por %p1183_p2, %p68_p6 }
  0x23   : > { %s56_s6 = ssub.s32 %s1117_s13, %s1360_s25  ;;  %s139_s7 = sand.u32 1, %s1109_s11  }
  0x24   : > { %p59_p11 = scmp.eq.s32.totalorder %s56_s6, 0  ;;  %s826_s8 = sshll.u32 %s139_s7, 4 }
  0x25   : > { %s838_s16 = sshll.u32 %s1117_s13, 8  ;;  %s143_s26 = scalar_lea.vmem [#allocation5], %s826_s8 }
  0x26   : > { %s1244_s15 = scalar_select %p59_p11, %s1109_s11, %s61_s3  }
  0x27   : > { %s150_s24 = scalar_lea.hbm %s1337_s1, %s838_s16  ;;  %s151_s29 = sshll.u32 %s143_s26, 4  ;;  %s152_s29 = int_to_ptr.vmem [resolvable:$true] %s151_s29 }
  0x28   : > { %p1252_p2 = pnand %p927_p0, %p1229_p12  ;;  %s140_s30 = scalar_lea.sflag [#allocation6], %s139_s7 }
  0x29   : > { %s1022_s6 = scalar_lea.vmem %s152_s29, 256  ;;  %s1126_s3 = smov [#allocation5]  }
  0x2a   : > { %p1011_p3 = pneg %p1252_p2  ;;  %p1023_p5 = scmp.ne.s32.totalorder %s152_s29, %s1022_s6 }
  0x2b   : > { %s1027_s27 = sshll.u32 %s1126_s3, 4  ;;  %s1028_s27 = int_to_ptr.vmem [resolvable:$false] %s1027_s27 }
  0x2c   : > { %p1025_p7 = pnand %p1023_p5, %p1011_p3  ;;  %s1029_s16 = scalar_lea.vmem %s1028_s27, 512 }
  0x2d   : > { %p1030_p6 = scmp.lt.s32.totalorder %s152_s29, %s1028_s27  ;;  %p1031_p9 = scmp.lt.s32.totalorder %s1029_s16, %s1022_s6 }
  0x2e   : > { %p1026_p4 = pneg %p1025_p7 }
  0x2f   : > { %p1032_p11 = por %p1031_p9, %p1030_p6 }
  0x31   : > { %p1033_p10 = pnand %p1032_p11, %p1026_p4 }
  0x33   : > { %1036 = shalt.err (!%p1033_p10)
}
  0x34   : > { %s1350_s4 = smov 128   ;;  %163 = sbr.rel (%p1199_p8) target bundleno = 300 (0x12c), region = 28 }
  0x35   : > { %921 = dma.hbm_to_vmem [thread:$0]  (!%p1252_p2), %s150_s24, 256, %s152_s29, %s140_s30, %s1350_s4, %s1350_s4, %s1125_s28  }
  0x39   : > { %1088 = dma.done.wait (%p1179_p1), [#allocation3], 256  }
  0x3a   : > { %1090 = vsyncadd (%p1179_p1), [#allocation3], 4294967040  ;;  %s1270_s27 = sand.u32 1, %s1105_s10   ;;  %p1351_p10 = scmp.ne.s32.totalorder %s1343_s19, 0 }
  0x3b   : > { %s831_s7 = sshll.u32 %s1270_s27, 4  ;;  %s170_s8 = scalar_lea.sflag [#allocation6], %s1270_s27 }
  0x3c   : > { %s173_s28 = scalar_lea.vmem [#allocation5], %s831_s7 }
  0x3d   : > { %1092 = dma.done.wait (%p1351_p10), %s170_s8, 256  }
  0x3e   : > { %1094 = vsyncadd (%p1351_p10), %s170_s8, 4294967040  ;;  %vm198_vm0 = vcmask 130048   ;;  %v197_v0 = vld [vmem:[%s173_s28 + $0x8] sm:$0xff]  ;;  %v196_v1 = vld [vmem:[%s173_s28] sm:$0xff]  ;;  %s193_s17 = scalar_lea.vmem [#allocation7], %s831_s7  ;;  %s839_s21 = sshll.u32 %s1113_s12, 8 }
  0x3f   : > { %v194_v2 = vld [vmem:[#allocation2] sm:$0xff]  ;;  %v234_v3 = vand.u32 4294901760, %v197_v0  ;;  %v237_v4 = vand.u32 4294901760, %v196_v1  ;;  %v195_v5 = vld [vmem:[#allocation2 + $0x8] sm:$0xff]  ;;  %s724_s19 = sshll.u32 %s193_s17, 4  ;;  %s1288_s24 = scalar_lea.hbm %s1338_s2, %s839_s21  ;;  %s1283_s19 = int_to_ptr.vmem [resolvable:$true] %s724_s19 }
  0x40   : > { %v200_v6 = vsel %vm198_vm0, %v194_v2, 0  ;;  %v203_v7 = vsel %vm198_vm0, %v195_v5, 0  ;;  %s710_s26 = scalar_lea.sflag [#allocation4], %s1270_s27  ;;  %s1037_s12 = scalar_lea.vmem %s1283_s19, 256 }
  0x41   : > { %v272_v8 = vand.u32 4294901760, %v200_v6  ;;  %864 = vmatprep.subr.mxu0 %v234_v3  ;;  %v322_v9 = vsub.f32 %v197_v0, %v234_v3  ;;  %v282_v10 = vand.u32 4294901760, %v203_v7  ;;  %v329_v11 = vsub.f32 %v196_v1, %v237_v4  ;;  %p1038_p1 = scmp.ne.s32.totalorder %s1283_s19, %s1037_s12  ;;  %s1127_s29 = smov [#allocation7]  }
  0x42   : > { %865 = vmatpush3.msra.mxu0 %v234_v3  ;;  %s1041_s18 = sshll.u32 %s1127_s29, 4  ;;  %s1042_s18 = int_to_ptr.vmem [resolvable:$false] %s1041_s18 }
  0x43   : > { %v273_v12 = vsub.f32 %v200_v6, %v272_v8  ;;  %875 = vmatprep.mubr.f32.mxu1 %v272_v8  ;;  %866 = vmatprep.subr.mxu0 %v237_v4  ;;  %v323_v13 = vand.u32 4294901760, %v322_v9  ;;  %v283_v14 = vsub.f32 %v203_v7, %v282_v10  ;;  %v330_v15 = vand.u32 4294901760, %v329_v11  ;;  %p1039_p8 = pnand %p1038_p1, %p1235_p13  ;;  %s1043_s30 = scalar_lea.vmem %s1042_s18, 512 }
  0x44   : > { %867 = vmatpush3.msra.mxu0 %v237_v4  ;;  %p1044_p0 = scmp.lt.s32.totalorder %s1283_s19, %s1042_s18  ;;  %p1045_p2 = scmp.lt.s32.totalorder %s1043_s30, %s1037_s12 }
  0x45   : > { %v274_v16 = vand.u32 4294901760, %v273_v12  ;;  %v324_v17 = vsub.f32 %v322_v9, %v323_v13  ;;  %v284_v18 = vand.u32 4294901760, %v283_v14  ;;  %v331_v19 = vsub.f32 %v329_v11, %v330_v15  ;;  %878 = vmatprep.subr.mxu0 %v322_v9  ;;  %p1040_p12 = pneg %p1039_p8 }
  0x46   : > { %p1046_p3 = por %p1045_p2, %p1044_p0 }
  0x47   : > { %v275_v20 = vsub.f32 %v273_v12, %v274_v16  ;;  %v325_v21 = vand.u32 4294901760, %v324_v17  ;;  %v285_v22 = vsub.f32 %v283_v14, %v284_v18  ;;  %v332_v23 = vand.u32 4294901760, %v331_v19 }
  0x48   : > { %p1047_p5 = pnand %p1046_p3, %p1040_p12 }
  0x49   : > { %v276_v24 = vand.u32 4294901760, %v275_v20  ;;  %871 = vmatprep.subr.mxu1 %v325_v21  ;;  %v286_v25 = vand.u32 4294901760, %v285_v22 }
  0x4a   : > { %872 = vmatpush3.msra.mxu1 %v325_v21 }
  0x4b   : > { %868 = vmatprep.mubr.f32.mxu0 %v276_v24  ;;  %873 = vmatprep.subr.mxu1 %v332_v23 }
  0x4c   : > { %869 = vmatmul.mubr.f32.vlgmr.msra.gmra.mxu0 %v286_v25  ;;  %874 = vmatpush3.msra.mxu1 %v332_v23 }
  0x4d   : > { %879 = vmatpush3.msra.mxu0 %v322_v9  ;;  %876 = vmatmul.mubr.f32.vlgmr.msra.gmra.mxu1 %v282_v10 }
  0x4e   : > { %880 = vmatprep.subr.mxu0 %v329_v11  ;;  %885 = vmatprep.subr.mxu1 %v234_v3 }
  0x4f   : > { %881 = vmatpush3.msra.mxu0 %v329_v11  ;;  %882 = vmatprep.mubr.f32.mxu0 %v273_v12 }
  0x50   : > { %886 = vmatpush3.msra.mxu1 %v234_v3  ;;  %883 = vmatmul.mubr.f32.vlgmr.msra.gmra.mxu0 %v283_v14 }
  0x51   : > { %887 = vmatprep.subr.mxu1 %v237_v4  ;;  %892 = vmatprep.subr.mxu0 %v323_v13 }
  0x52   : > { %888 = vmatpush3.msra.mxu1 %v237_v4  ;;  %889 = vmatprep.mubr.f32.mxu1 %v274_v16 }
  0x53   : > { %893 = vmatpush3.msra.mxu0 %v323_v13  ;;  %890 = vmatmul.mubr.f32.vlgmr.msra.gmra.mxu1 %v284_v18 }
  0x54   : > { %894 = vmatprep.subr.mxu0 %v330_v15  ;;  %899 = vmatprep.subr.mxu1 %v234_v3 }
  0x55   : > { %895 = vmatpush3.msra.mxu0 %v330_v15  ;;  %896 = vmatprep.mubr.f32.mxu0 %v272_v8 }
  0x56   : > { %900 = vmatpush3.msra.mxu1 %v234_v3  ;;  %897 = vmatmul.mubr.f32.vlgmr.msra.gmra.mxu0 %v282_v10 }
  0x57   : > { %901 = vmatprep.subr.mxu1 %v237_v4  ;;  %903 = vmatprep.mubr.f32.mxu1 %v272_v8 }
  0x58   : > { %902 = vmatpush3.msra.mxu1 %v237_v4 }
  0x59   : > { %904 = vmatmul.mubr.f32.vlgmr.msra.gmra.mxu1 %v282_v10 }
 0x10c   : > { %v870_v26 = vpop.f32.mrf.mxu0 }
 0x10d   : > { %v877_v28 = vpop.f32.mrf.mxu1 }
 0x10e   : > { %v278_v27 = vpop.f32.mrf.mxu0  ;;  %v376_v29 = vadd.f32 %v877_v28, %v870_v26 }
 0x10f   : > { %v369_v30 = vpop.f32.mrf.mxu1 }
 0x110   : > { %v370_v31 = vadd.f32 %v369_v30, %v278_v27  ;;  %v884_v32 = vpop.f32.mrf.mxu0 }
 0x111   : > { %v459_v33 = vadd.f32 %v884_v32, %v376_v29 }
 0x112   : > { %v451_v34 = vpop.f32.mrf.mxu0 }
 0x113   : > { %v452_v35 = vadd.f32 %v451_v34, %v370_v31  ;;  %v891_v36 = vpop.f32.mrf.mxu1 }
 0x114   : > { %v542_v37 = vadd.f32 %v891_v36, %v459_v33 }
 0x115   : > { %v533_v38 = vpop.f32.mrf.mxu1 }
 0x116   : > { %v534_v39 = vadd.f32 %v533_v38, %v452_v35  ;;  %v898_v40 = vpop.f32.mrf.mxu0 }
 0x117   : > { %v625_v41 = vadd.f32 %v898_v40, %v542_v37 }
 0x118   : > { %v618_v42 = vpop.f32.mrf.mxu0 }
 0x119   : > { %v905_v43 = vpop.f32.mrf.mxu1  ;;  %v619_v44 = vadd.f32 %v618_v42, %v534_v39 }
 0x11a   : > { %v704_v45 = vadd.f32 %v905_v43, %v625_v41 }
 0x11b   : > { %v697_v46 = vpop.f32.mrf.mxu1 }
 0x11c   : > { %708 = vst [vmem:[%s193_s17 + $0x8] sm:$0xff] %v704_v45  ;;  %v698_v47 = vadd.f32 %v697_v46, %v619_v44 }
 0x11e   : > { %707 = vst [vmem:[%s193_s17] sm:$0xff] %v698_v47 }
 0x11f   : > { %1050 = shalt.err (!%p1047_p5)
}
 0x120   : > { %s1051_s6 = scalar_lea.hbm %s1288_s24, 256  ;;  %s1055_s4 = scalar_lea.hbm %s1338_s2, 512 }
 0x121   : > { %p1052_p7 = scmp.ne.s32.totalorder %s1288_s24, %s1051_s6  ;;  %p1056_p9 = scmp.lt.s32.totalorder %s1288_s24, %s1338_s2 }
 0x122   : > { %p1057_p11 = scmp.lt.s32.totalorder %s1055_s4, %s1051_s6 }
 0x123   : > { %p1053_p4 = pnand %p1052_p7, %p1235_p13 }
 0x124   : > { %p1058_p10 = por %p1057_p11, %p1056_p9 }
 0x125   : > { %p1054_p6 = pneg %p1053_p4 }
 0x127   : > { %p1059_p1 = pnand %p1058_p10, %p1054_p6 }
 0x129   : > { %1062 = shalt.err (!%p1059_p1)
}
 0x12a   : > { %s1128_s28 = smov 128   ;;  %s1129_s17 = smov 8  }
 0x12b   : > { %912 = dma.vmem_to_hbm [thread:$0]  (%p1235_p13), %s1283_s19, 256, %s1288_s24, %s710_s26, %s1128_s28, %s1128_s28, %s1129_s17  }
 0x12c PF: > { %s739_s21 = sand.u32 1, %s1101_s9   ;;  %p1352_p8 = scmp.ne.s32.totalorder %s1344_s20, 0 }
 0x12d   : > { %p1353_p12 = scmp.ge.s32.totalorder %s1121_s14, 2  ;;  %s740_s22 = scalar_lea.sflag [#allocation4], %s739_s21 }
 0x12f   : > { %p923_p0 = pnand %p1353_p12, %p1352_p8 }
 0x131   : > { %p924_p2 = pneg %p923_p0 }
 0x133   : > { %1096 = dma.done.wait (%p924_p2), %s740_s22, 256  }
 0x134   : > { %1098 = vsyncadd (%p924_p2), %s740_s22, 4294967040  ;;  %s19_s14 = sadd.s32 1, %s1121_s14   ;;  %s1354_s9 = smov %s1105_s10 }
 0x135   : > { %p16_p3 = scmp.ge.s32.totalorder %s19_s14, 4   ;;  %s1355_s10 = smov %s1109_s11 }
 0x136   : > { %s1356_s11 = smov %s1244_s15  ;;  %s1357_s12 = smov %s1117_s13 }
 0x137   : > { %s1358_s13 = smov %s1360_s25  ;;  %18 = sbr.rel (!%p16_p3) target bundleno = 7 (0x7), region = 78 }
 0x13c   :  { %745 = vsyncpa [#allocation3], 1 }
 0x13d   :  { %747 = vsyncpa [#allocation3 + $0x1], 1 }
 0x13e   :  { %748 = vsyncpa [#allocation6], 1 }
 0x13f   :  { %750 = vsyncpa [#allocation6 + $0x1], 1 }
 0x140   :  { %751 = vsyncpa [#allocation4], 1 }
 0x141   :  { %753 = vsyncpa [#allocation4 + $0x1], 1 }

</bundles_post_ra>
